<compile_context>
chip_gen: v7x
topology: tpu7x:2x2x1
jax: 0.10.0
libtpu: 0.0.40
codegen_flags: <defaults>
</compile_context>

<pallas_src>
import functools

import jax
import jax.numpy as jnp
from jax import lax
from jax.experimental import pallas as pl
from jax.experimental.pallas import tpu as pltpu


def _l1_loss_kernel(out_ref, label_ref, sum_ref, cnt_ref, acc_sum, acc_cnt,
                    *, normalize, ignore_index, hw, tile_hw):
    j = pl.program_id(1)

    @pl.when(j == 0)
    def _():
        acc_sum[...] = jnp.zeros_like(acc_sum)
        acc_cnt[...] = jnp.zeros_like(acc_cnt)

    o = out_ref[0].astype(jnp.float32)      # (C, tile_hw)
    lbl = label_ref[0].astype(jnp.float32)  # (C, tile_hw)

    if normalize:
        # torch.nn.functional.normalize(p=2, dim=1, eps=1e-12):
        #   out / max(||out||_2, 1e-12)  ==  out * rsqrt(max(sumsq, 1e-24))
        sumsq = jnp.sum(o * o, axis=0, keepdims=True)            # (1, tile_hw)
        inv = lax.rsqrt(jnp.maximum(sumsq, jnp.float32(1e-24)))  # EUP
        o = o * inv

    # A pixel is valid iff ALL channels of the label differ from ignore_index.
    valid = jnp.all(lbl != jnp.float32(ignore_index), axis=0, keepdims=True)

    if hw % tile_hw != 0:
        # Mask the ragged tail of the last spatial tile (static check, so this
        # code is only emitted when a ragged tail actually exists).
        pos = j * tile_hw + lax.broadcasted_iota(jnp.int32, (1, tile_hw), 1)
        valid = jnp.logical_and(valid, pos < hw)

    # `where` (not multiply) so undefined data in a partial tile can't inject
    # NaN/Inf into the accumulator.
    diff = jnp.where(valid, jnp.abs(o - lbl), jnp.float32(0.0))  # (C, tile_hw)

    # Pure VPU accumulation into vector scratch; no per-step scalar reduce.
    acc_sum[...] += diff
    acc_cnt[...] += valid.astype(jnp.float32)

    @pl.when(j == pl.num_programs(1) - 1)
    def _():
        sum_ref[...] = jnp.sum(acc_sum[...]).reshape(1, 1, 1)
        cnt_ref[...] = jnp.sum(acc_cnt[...]).reshape(1, 1, 1)


def _choose_tile_hw(hw, c, itemsize, vmem_budget=20 << 20):
    """Pick a lane-dim tile from a total-VMEM footprint budget (mult. of 128).

    Footprint per lane of tile:
      - two input tensors, double-buffered by the BlockSpec pipeline
      - f32 |diff| accumulator (C sublanes, padded to a multiple of 8)
      - f32 valid-count accumulator (1 sublane, padded to 8)
    """
    c_pad = -(-c // 8) * 8
    bytes_per_lane = 2 * 2 * c * itemsize + (c_pad + 8) * 4
    t = vmem_budget // max(1, bytes_per_lane)
    t = max(128, (t // 128) * 128)
    if hw <= t:
        return hw          # one block covering the full spatial extent
    return t


def l1_loss_pallas(out, label, *, normalize=False, ignore_index=255,
                   reduction="mean", tile_hw=None):
    """out, label: NCHW arrays of the same shape. Returns a scalar loss."""
    assert out.shape == label.shape
    B, C, H, W = out.shape
    hw = H * W

    # Free reshape: collapse the contiguous spatial dims (no transpose, no pad).
    out3 = out.reshape(B, C, hw)
    lbl3 = label.reshape(B, C, hw)

    itemsize = jnp.dtype(out.dtype).itemsize
    if tile_hw is None:
        tile_hw = _choose_tile_hw(hw, C, itemsize)
    else:
        tile_hw = min(tile_hw, hw)
        if tile_hw != hw:
            tile_hw = max(128, (tile_hw // 128) * 128)
    n_tiles = pl.cdiv(hw, tile_hw)

    kernel = functools.partial(
        _l1_loss_kernel, normalize=normalize, ignore_index=ignore_index,
        hw=hw, tile_hw=tile_hw)

    sums, cnts = pl.pallas_call(
        kernel,
        out_shape=(jax.ShapeDtypeStruct((B, 1, 1), jnp.float32),
                   jax.ShapeDtypeStruct((B, 1, 1), jnp.float32)),
        grid_spec=pltpu.PrefetchScalarGridSpec(
            num_scalar_prefetch=0,
            grid=(B, n_tiles),
            in_specs=[
                pl.BlockSpec((1, C, tile_hw), lambda b, j: (b, 0, j)),
                pl.BlockSpec((1, C, tile_hw), lambda b, j: (b, 0, j)),
            ],
            out_specs=[
                pl.BlockSpec((1, 1, 1), lambda b, j: (b, 0, 0)),
                pl.BlockSpec((1, 1, 1), lambda b, j: (b, 0, 0)),
            ],
            scratch_shapes=[
                pltpu.VMEM((C, tile_hw), jnp.float32),   # per-channel |diff| acc
                pltpu.VMEM((1, tile_hw), jnp.float32),   # valid-pixel count acc
            ],
        ),
        compiler_params=pltpu.CompilerParams(
            dimension_semantics=("parallel", "arbitrary")),
        cost_estimate=pl.CostEstimate(
            flops=5 * B * C * hw,
            transcendentals=(B * hw) if normalize else 0,
            bytes_accessed=2 * B * C * hw * itemsize),
    )(out3, lbl3)

    abs_sum = jnp.sum(sums)
    n_valid = jnp.sum(cnts)

    if reduction == "mean":
        # Matches the PyTorch module: sum of |diff| over valid elements divided
        # by the number of valid PIXELS (not elements), as in the ATRC code.
        return abs_sum / jnp.maximum(n_valid, 1.0)
    elif reduction == "sum":
        return abs_sum
    else:
        # TODO(synk): reduction='none' returns a variable-length masked_select
        # result in PyTorch; no static-shape Pallas equivalent implemented.
        raise NotImplementedError("reduction='none' not supported")


def l1_loss_ref(out, label, *, normalize=False, ignore_index=255):
    """Pure-JAX reference mirroring the PyTorch module."""
    out = out.astype(jnp.float32)
    label = label.astype(jnp.float32)
    if normalize:
        norm = jnp.sqrt(jnp.sum(out * out, axis=1, keepdims=True))
        out = out / jnp.maximum(norm, 1e-12)
    mask = jnp.all(label != ignore_index, axis=1, keepdims=True)  # (B,1,H,W)
    n_valid = jnp.sum(mask.astype(jnp.float32))
    diff = jnp.abs(out - label) * mask.astype(jnp.float32)
    return jnp.sum(diff) / jnp.maximum(n_valid, 1.0)


if __name__ == "__main__":
    key = jax.random.PRNGKey(0)
    k1, k2, k3 = jax.random.split(key, 3)

    B, C, H, W = 2, 4, 16, 16   # small NCHW shapes
    ignore_index = 255

    out = jax.random.normal(k1, (B, C, H, W), dtype=jnp.float32)
    label = jax.random.normal(k2, (B, C, H, W), dtype=jnp.float32)

    # Mark roughly 25% of the pixels as ignored (all channels = ignore_index).
    ignore_mask = jax.random.uniform(k3, (B, 1, H, W)) < 0.25
    label = jnp.where(ignore_mask, jnp.float32(ignore_index), label)

    loss = l1_loss_pallas(out, label, normalize=False,
                          ignore_index=ignore_index, reduction="mean")
    loss = jax.block_until_ready(loss)

    ref = l1_loss_ref(out, label, normalize=False, ignore_index=ignore_index)
    assert jnp.allclose(loss, ref, rtol=1e-5, atol=1e-5), (loss, ref)

    # Also exercise the normalize=True path (surface-normal mode).
    loss_n = jax.block_until_ready(
        l1_loss_pallas(out, label, normalize=True,
                       ignore_index=ignore_index, reduction="mean"))
    ref_n = l1_loss_ref(out, label, normalize=True, ignore_index=ignore_index)
    assert jnp.allclose(loss_n, ref_n, rtol=1e-5, atol=1e-5), (loss_n, ref_n)

    # reduction='sum' path
    loss_s = jax.block_until_ready(
        l1_loss_pallas(out, label, normalize=False,
                       ignore_index=ignore_index, reduction="sum"))
    mask = jnp.all(label != ignore_index, axis=1, keepdims=True)
    ref_s = jnp.sum(jnp.abs(out - label) * mask.astype(jnp.float32))
    assert jnp.allclose(loss_s, ref_s, rtol=1e-5, atol=1e-5), (loss_s, ref_s)

    # Exercise a multi-tile + ragged-tail configuration to cover the masking path.
    loss_t = jax.block_until_ready(
        l1_loss_pallas(out, label, normalize=False,
                       ignore_index=ignore_index, reduction="mean",
                       tile_hw=128))
    assert jnp.allclose(loss_t, ref, rtol=1e-5, atol=1e-5), (loss_t, ref)

    print("KERNEL_OK")
</pallas_src>

<mosaic_0001>
module attributes {stable_mosaic.version = 11 : i64} {
  func.func @_l1_loss_kernel(%arg0: i32, %arg1: i32, %arg2: memref<1x4x256xf32, #tpu.memory_space<vmem>>, %arg3: memref<1x4x256xf32, #tpu.memory_space<vmem>>, %arg4: memref<1x1x1xf32, #tpu.memory_space<vmem>>, %arg5: memref<1x1x1xf32, #tpu.memory_space<vmem>>, %arg6: memref<4x256xf32, #tpu.memory_space<vmem>>, %arg7: memref<1x256xf32, #tpu.memory_space<vmem>>) attributes {dimension_semantics = [#tpu.dimension_semantics<parallel>, #tpu.dimension_semantics<arbitrary>], iteration_bounds = array<i64: 2, 1>, scalar_prefetch = 0 : i64, scratch_operands = 2 : i64, tpu.core_type = #tpu.core_type<tc>, window_params = [{transform_indices = @transform_0, window_bounds = array<i64: 1, 4, 256>}, {transform_indices = @transform_1, window_bounds = array<i64: 1, 4, 256>}, {transform_indices = @transform_2, window_bounds = array<i64: 1, 1, 1>}, {transform_indices = @transform_3, window_bounds = array<i64: 1, 1, 1>}]} {
    %c0_i32 = arith.constant 0 : i32
    %0 = arith.cmpi eq, %arg1, %c0_i32 : i32
    %1 = arith.extui %0 : i1 to i32
    %c0_i32_0 = arith.constant 0 : i32
    %2 = arith.cmpi ne, %1, %c0_i32_0 : i32
    scf.if %2 {
      %cst_21 = arith.constant 0.000000e+00 : f32
      %33 = vector.broadcast %cst_21 : f32 to vector<4x256xf32>
      %c0_22 = arith.constant 0 : index
      %c0_23 = arith.constant 0 : index
      %34 = vector.load %arg6[%c0_22, %c0_23] : memref<4x256xf32, #tpu.memory_space<vmem>>, vector<4x256xf32>
      tpu.vector_store %arg6[%c0_22, %c0_23], %33 {strides = array<i32>} : memref<4x256xf32, #tpu.memory_space<vmem>>, vector<4x256xf32>,
      %cst_24 = arith.constant 0.000000e+00 : f32
      %35 = vector.broadcast %cst_24 : f32 to vector<1x256xf32>
      %c0_25 = arith.constant 0 : index
      %c0_26 = arith.constant 0 : index
      %36 = vector.load %arg7[%c0_25, %c0_26] : memref<1x256xf32, #tpu.memory_space<vmem>>, vector<1x256xf32>
      tpu.vector_store %arg7[%c0_25, %c0_26], %35 {strides = array<i32>} : memref<1x256xf32, #tpu.memory_space<vmem>>, vector<1x256xf32>,
    } else {
    }
    %c0 = arith.constant 0 : index
    %c0_1 = arith.constant 0 : index
    %c0_2 = arith.constant 0 : index
    %3 = vector.load %arg2[%c0, %c0_1, %c0_2] : memref<1x4x256xf32, #tpu.memory_space<vmem>>, vector<1x4x256xf32>
    %4 = vector.shape_cast %3 : vector<1x4x256xf32> to vector<4x256xf32>
    %c0_3 = arith.constant 0 : index
    %c0_4 = arith.constant 0 : index
    %c0_5 = arith.constant 0 : index
    %5 = vector.load %arg3[%c0_3, %c0_4, %c0_5] : memref<1x4x256xf32, #tpu.memory_space<vmem>>, vector<1x4x256xf32>
    %6 = vector.shape_cast %5 : vector<1x4x256xf32> to vector<4x256xf32>
    %cst = arith.constant 2.550000e+02 : f32
    %7 = vector.broadcast %cst : f32 to vector<4x256xf32>
    %8 = arith.cmpf one, %6, %7 : vector<4x256xf32>
    %cst_6 = arith.constant 1.000000e+00 : f32
    %cst_7 = arith.constant 0.000000e+00 : f32
    %9 = vector.broadcast %cst_6 : f32 to vector<4x256xf32>
    %10 = vector.broadcast %cst_7 : f32 to vector<4x256xf32>
    %11 = arith.select %8, %9, %10 : vector<4x256xi1>, vector<4x256xf32>
    %cst_8 = arith.constant dense<0x7F800000> : vector<256xf32>
    %12 = vector.multi_reduction <minimumf>, %11, %cst_8 [0] : vector<4x256xf32> to vector<256xf32>
    %cst_9 = arith.constant 0.000000e+00 : f32
    %13 = vector.broadcast %cst_9 : f32 to vector<256xf32>
    %14 = arith.cmpf ogt, %12, %13 : vector<256xf32>
    %15 = vector.shape_cast %14 : vector<256xi1> to vector<1x256xi1>
    %16 = arith.subf %4, %6 : vector<4x256xf32>
    %17 = math.absf %16 : vector<4x256xf32>
    %cst_10 = arith.constant 0.000000e+00 : f32
    %18 = vector.shape_cast %15 : vector<1x256xi1> to vector<1x256xi1>
    %19 = vector.broadcast %18 : vector<1x256xi1> to vector<4x256xi1>
    %20 = vector.broadcast %cst_10 : f32 to vector<4x256xf32>
    %21 = arith.select %19, %17, %20 : vector<4x256xi1>, vector<4x256xf32>
    %c0_11 = arith.constant 0 : index
    %c0_12 = arith.constant 0 : index
    %22 = vector.load %arg6[%c0_11, %c0_12] : memref<4x256xf32, #tpu.memory_space<vmem>>, vector<4x256xf32>
    %23 = arith.addf %22, %21 : vector<4x256xf32>
    %c0_13 = arith.constant 0 : index
    %c0_14 = arith.constant 0 : index
    %24 = vector.load %arg6[%c0_13, %c0_14] : memref<4x256xf32, #tpu.memory_space<vmem>>, vector<4x256xf32>
    tpu.vector_store %arg6[%c0_13, %c0_14], %23 {strides = array<i32>} : memref<4x256xf32, #tpu.memory_space<vmem>>, vector<4x256xf32>,
    %c0_15 = arith.constant 0 : index
    %c0_16 = arith.constant 0 : index
    %25 = vector.load %arg7[%c0_15, %c0_16] : memref<1x256xf32, #tpu.memory_space<vmem>>, vector<1x256xf32>
    %26 = arith.extui %15 : vector<1x256xi1> to vector<1x256xi32>
    %27 = arith.sitofp %26 : vector<1x256xi32> to vector<1x256xf32>
    %28 = arith.addf %25, %27 : vector<1x256xf32>
    %c0_17 = arith.constant 0 : index
    %c0_18 = arith.constant 0 : index
    %29 = vector.load %arg7[%c0_17, %c0_18] : memref<1x256xf32, #tpu.memory_space<vmem>>, vector<1x256xf32>
    tpu.vector_store %arg7[%c0_17, %c0_18], %28 {strides = array<i32>} : memref<1x256xf32, #tpu.memory_space<vmem>>, vector<1x256xf32>,
    %c0_i32_19 = arith.constant 0 : i32
    %30 = arith.cmpi eq, %arg1, %c0_i32_19 : i32
    %31 = arith.extui %30 : i1 to i32
    %c0_i32_20 = arith.constant 0 : i32
    %32 = arith.cmpi ne, %31, %c0_i32_20 : i32
    scf.if %32 {
      %c0_21 = arith.constant 0 : index
      %c0_22 = arith.constant 0 : index
      %33 = vector.load %arg6[%c0_21, %c0_22] : memref<4x256xf32, #tpu.memory_space<vmem>>, vector<4x256xf32>
      %34 = vector.shape_cast %33 : vector<4x256xf32> to vector<1x4x256xf32>
      %cst_23 = arith.constant dense<0.000000e+00> : vector<1xf32>
      %35 = vector.multi_reduction <add>, %34, %cst_23 [1, 2] : vector<1x4x256xf32> to vector<1xf32>
      %36 = vector.shape_cast %35 : vector<1xf32> to vector<1x1x1xf32>
      %37 = vector.extract %36[0, 0, 0] : f32 from vector<1x1x1xf32>
      %38 = vector.broadcast %37 : f32 to vector<1x1x1xf32>
      %c0_24 = arith.constant 0 : index
      %c0_25 = arith.constant 0 : index
      %c0_26 = arith.constant 0 : index
      %39 = vector.load %arg4[%c0_24, %c0_25, %c0_26] : memref<1x1x1xf32, #tpu.memory_space<vmem>>, vector<1x1x1xf32>
      tpu.vector_store %arg4[%c0_24, %c0_25, %c0_26], %38 {strides = array<i32>} : memref<1x1x1xf32, #tpu.memory_space<vmem>>, vector<1x1x1xf32>,
      %c0_27 = arith.constant 0 : index
      %c0_28 = arith.constant 0 : index
      %40 = vector.load %arg7[%c0_27, %c0_28] : memref<1x256xf32, #tpu.memory_space<vmem>>, vector<1x256xf32>
      %41 = vector.shape_cast %40 : vector<1x256xf32> to vector<1x1x256xf32>
      %cst_29 = arith.constant dense<0.000000e+00> : vector<1xf32>
      %42 = vector.multi_reduction <add>, %41, %cst_29 [1, 2] : vector<1x1x256xf32> to vector<1xf32>
      %43 = vector.shape_cast %42 : vector<1xf32> to vector<1x1x1xf32>
      %44 = vector.extract %43[0, 0, 0] : f32 from vector<1x1x1xf32>
      %45 = vector.broadcast %44 : f32 to vector<1x1x1xf32>
      %c0_30 = arith.constant 0 : index
      %c0_31 = arith.constant 0 : index
      %c0_32 = arith.constant 0 : index
      %46 = vector.load %arg5[%c0_30, %c0_31, %c0_32] : memref<1x1x1xf32, #tpu.memory_space<vmem>>, vector<1x1x1xf32>
      tpu.vector_store %arg5[%c0_30, %c0_31, %c0_32], %45 {strides = array<i32>} : memref<1x1x1xf32, #tpu.memory_space<vmem>>, vector<1x1x1xf32>,
    } else {
    }
    return
  }
  func.func @transform_0(%arg0: i32, %arg1: i32) -> (i32, i32, i32) {
    %c0_i32 = arith.constant 0 : i32
    %c0_i32_0 = arith.constant 0 : i32
    return %arg0, %c0_i32, %arg1 : i32, i32, i32
  }
  func.func @transform_1(%arg0: i32, %arg1: i32) -> (i32, i32, i32) {
    %c0_i32 = arith.constant 0 : i32
    %c0_i32_0 = arith.constant 0 : i32
    return %arg0, %c0_i32, %arg1 : i32, i32, i32
  }
  func.func @transform_2(%arg0: i32, %arg1: i32) -> (i32, i32, i32) {
    %c0_i32 = arith.constant 0 : i32
    %c0_i32_0 = arith.constant 0 : i32
    %c0_i32_1 = arith.constant 0 : i32
    return %arg0, %c0_i32, %c0_i32_0 : i32, i32, i32
  }
  func.func @transform_3(%arg0: i32, %arg1: i32) -> (i32, i32, i32) {
    %c0_i32 = arith.constant 0 : i32
    %c0_i32_0 = arith.constant 0 : i32
    %c0_i32_1 = arith.constant 0 : i32
    return %arg0, %c0_i32, %c0_i32_0 : i32, i32, i32
  }
}

</mosaic_0001>

<bundles_post_ra>
// kernel: tpu_custom_call.1
= control target key start
LH: loop header
LB: loop body
LE: loop exit
PB: predicated region body
PF: predicated region fallthrough
CT: control target
= control target key end

     0   :  { %9 = vsyncpa [#allocation5], 0  ;;  %s958_s0 = inlined_call_operand.hbm [shape: f32[2,4,256], index: 0, kind: input, shape index: {}]   ;;  %s959_s1 = inlined_call_operand.hbm [shape: f32[2,4,256], index: 1, kind: input, shape index: {}]   ;;  %s960_s2 = inlined_call_operand.vmem [shape: f32[2,1,1], index: 2, kind: output, shape index: {0}]   ;;  %s961_s3 = inlined_call_operand.vmem [shape: f32[2,1,1], index: 3, kind: output, shape index: {1}]  }
   0x1   :  { %11 = vsyncpa [#allocation5 + $0x1], 0 }
   0x2   :  { %12 = vsyncpa [#allocation7], 0 }
   0x3   :  { %14 = vsyncpa [#allocation7 + $0x1], 0  ;;  %s771_s12 = smov 0   ;;  %s773_s13 = smov 0  }
   0x4   :  { %s775_s14 = smov 0   ;;  %s777_s15 = smov 0  }
   0x5   :  { %s779_s16 = smov 0   ;;  %s781_s17 = smov 0  }
   0x6 LB: > { %s546_s18 = sadd.s32 4294967295, %s745_s17   ;;  %s32_s19 = sadd.s32 1, %s741_s16  ;;  %s745_s17 = sphi %s781_s17, %s20_s17   ;;  %s741_s16 = sphi %s779_s16, %s977_s16   ;;  %s737_s15 = sphi %s777_s15, %s976_s15   ;;  %s733_s14 = sphi %s775_s14, %s975_s14   ;;  %s729_s13 = sphi %s773_s13, %s974_s13   ;;  %s725_s12 = sphi %s771_s12, %s973_s12  }
   0x7   : > { %p34_p0 = scmp.ge.s32.totalorder %s32_s19, 2  ;;  %s41_s20 = sadd.s32 1, %s733_s14 }
   0x8   : > { %p48_p1 = scmp.ne.s32.totalorder %s733_s14, %s729_s13  ;;  %p49_p2 = scmp.eq.s32.totalorder %s745_s17, 0 }
   0x9   : > { %s979_s19 = smov (%p34_p0, %s32_s19), 0  ;;  %p54_p4 = scmp.ne.s32.totalorder %s729_s13, %s725_s12 }
   0xa   : > { %p807_p3 = por %p49_p2, %p48_p1  ;;  %s36_s22 = ssub.s32 %s741_s16, %s979_s19 }
   0xb   : > { %p55_p5 = scmp.eq.s32.totalorder %s546_s18, 0  ;;  %p39_p6 = scmp.eq.s32.totalorder %s36_s22, 0 }
   0xc   : > { %p580_p8 = scmp.lt.s32.totalorder %s745_s17, 2  ;;  %s823_s25 = sand.u32 1, %s733_s14  }
   0xd   : > { %p814_p7 = por %p55_p5, %p54_p4  ;;  %s563_s26 = sshll.u32 %s741_s16, 7 }
   0xe   : > { %s820_s24 = scalar_select %p39_p6, %s733_s14, %s41_s20  }
   0xf   : > { %s964_s23 = scalar_select %p814_p7, 1, 0 }
  0x10   : > { %s550_s27 = sshll.u32 %s823_s25, 3  ;;  %s832_s30 = scalar_lea.hbm %s958_s0, %s563_s26 }
  0x11   : > { %s162_s4 = scalar_lea.vmem [#allocation4], %s550_s27  ;;  %p838_p9 = pnand %p580_p8, %p807_p3 }
  0x12   : > { %s172_s5 = sshll.u32 %s162_s4, 4  ;;  %s159_s7 = scalar_lea.sflag [#allocation5], %s823_s25  ;;  %s842_s5 = int_to_ptr.vmem [resolvable:$true] %s172_s5 }
  0x13   : > { %s631_s8 = scalar_lea.hbm %s832_s30, 128  ;;  %p633_p13 = pneg %p838_p9 }
  0x14   : > { %p632_p12 = scmp.ne.s32.totalorder %s832_s30, %s631_s8  ;;  %s636_s11 = scalar_lea.hbm %s958_s0, 256 }
  0x15   : > { %p637_p2 = scmp.lt.u32.totalorder %s832_s30, %s958_s0  ;;  %p638_p3 = scmp.lt.u32.totalorder %s636_s11, %s631_s8 }
  0x16   : > { %p634_p0 = pnand %p633_p13, %p632_p12  ;;  %p640_p5 = scmp.lt.u32.totalorder %s631_s8, %s832_s30 }
  0x17   : > { %p639_p4 = por %p638_p3, %p637_p2 }
  0x18   : > { %p635_p1 = pneg %p634_p0 }
  0x19   : > { %p641_p6 = por %p640_p5, %p639_p4 }
  0x1b   : > { %p642_p8 = pnand %p641_p6, %p635_p1 }
  0x1d   : > { %645 = shalt.err (!%p642_p8)
}
  0x1e   : > { %s646_s20 = scalar_lea.vmem %s842_s5, 128  ;;  %s747_s21 = smov [#allocation4]  }
  0x1f   : > { %p647_p12 = scmp.ne.s32.totalorder %s842_s5, %s646_s20  ;;  %s651_s22 = sshll.u32 %s747_s21, 4  ;;  %s652_s22 = int_to_ptr.vmem [resolvable:$false] %s651_s22 }
  0x20   : > { %s653_s28 = scalar_lea.vmem %s652_s22, 256  ;;  %p654_p11 = scmp.lt.s32.totalorder %s842_s5, %s652_s22 }
  0x21   : > { %p649_p0 = pnand %p647_p12, %p633_p13  ;;  %p655_p2 = scmp.lt.s32.totalorder %s653_s28, %s646_s20 }
  0x23   : > { %p650_p10 = pneg %p649_p0  ;;  %p656_p3 = por %p655_p2, %p654_p11 }
  0x25   : > { %p657_p4 = pnand %p656_p3, %p650_p10 }
  0x27   : > { %660 = shalt.err (!%p657_p4)
}
  0x28   : > { %576 = dma.hbm_to_vmem [thread:$0]  (!%p838_p9), %s832_s30, 128, %s842_s5, %s159_s7  }
  0x29   : > { %p966_p1 = scmp.lt.s32.totalorder %s745_s17, 3  ;;  %p967_p5 = scmp.ge.s32.totalorder %s745_s17, 1 }
  0x2a   : > { %s885_s9 = scalar_lea.hbm %s959_s1, %s563_s26  ;;  %s183_s10 = scalar_lea.vmem [#allocation6], %s550_s27 }
  0x2b   : > { %p876_p6 = pnand %p967_p5, %p966_p1  ;;  %s193_s11 = sshll.u32 %s183_s10, 4  ;;  %s194_s11 = int_to_ptr.vmem [resolvable:$true] %s193_s11 }
  0x2c   : > { %s180_s30 = scalar_lea.sflag [#allocation7], %s823_s25  ;;  %s661_s5 = scalar_lea.hbm %s885_s9, 128 }
  0x2d   : > { %s968_s29 = scalar_select %p876_p6, 1, 0 }
  0x2e   : > { %p662_p10 = scmp.ne.s32.totalorder %s885_s9, %s661_s5  ;;  %s666_s26 = scalar_lea.hbm %s959_s1, 256 }
  0x2f   : > { %p667_p12 = scmp.lt.u32.totalorder %s885_s9, %s959_s1  ;;  %p668_p0 = scmp.lt.u32.totalorder %s666_s26, %s661_s5 }
  0x30   : > { %p664_p11 = pnand %p662_p10, %p633_p13  ;;  %p670_p3 = scmp.lt.u32.totalorder %s661_s5, %s885_s9 }
  0x31   : > { %p669_p2 = por %p668_p0, %p667_p12 }
  0x32   : > { %p665_p8 = pneg %p664_p11 }
  0x33   : > { %p671_p4 = por %p670_p3, %p669_p2 }
  0x35   : > { %p672_p1 = pnand %p671_p4, %p665_p8 }
  0x37   : > { %675 = shalt.err (!%p672_p1)
}
  0x38   : > { %s676_s25 = scalar_lea.vmem %s194_s11, 128  ;;  %s748_s27 = smov [#allocation6]  }
  0x39   : > { %p677_p5 = scmp.ne.s32.totalorder %s194_s11, %s676_s25  ;;  %s681_s21 = sshll.u32 %s748_s27, 4  ;;  %s682_s21 = int_to_ptr.vmem [resolvable:$false] %s681_s21 }
  0x3a   : > { %s683_s22 = scalar_lea.vmem %s682_s21, 256  ;;  %p684_p7 = scmp.lt.s32.totalorder %s194_s11, %s682_s21 }
  0x3b   : > { %p679_p10 = pnand %p677_p5, %p633_p13  ;;  %p685_p6 = scmp.lt.s32.totalorder %s683_s22, %s676_s25 }
  0x3d   : > { %p680_p11 = pneg %p679_p10  ;;  %p686_p0 = por %p685_p6, %p684_p7 }
  0x3f   : > { %p687_p12 = pnand %p686_p0, %p680_p11 }
  0x41   : > { %690 = shalt.err (!%p687_p12)
}
  0x42   : > { %579 = dma.hbm_to_vmem [thread:$0]  (!%p838_p9), %s885_s9, 128, %s194_s11, %s180_s30  }
  0x43   : > { %p969_p8 = scmp.ne.s32.totalorder %s968_s29, 0 }
  0x44   : > { %s204_s28 = sand.u32 (!%p969_p8), 1, %s729_s13   ;;  %p970_p13 = scmp.ne.s32.totalorder (!%p969_p8), %s964_s23, 0 }
  0x45   : > { %202 = sbr.rel (%p969_p8) target bundleno = 328 (0x148), region = 28  ;;  %s557_s4 = sshll.u32 (!%p969_p8), %s204_s28, 3 }
  0x46   : > { %s205_s8 = scalar_lea.sflag (!%p969_p8), [#allocation5], %s204_s28  ;;  %s208_s10 = scalar_lea.vmem (!%p969_p8), [#allocation4], %s557_s4 }
  0x4c   : > { %716 = dma.done.wait (%p970_p13), %s205_s8, 128  }
  0x4d   : > { %718 = vsyncadd (%p970_p13), %s205_s8, 4294967168  ;;  %s214_s5 = scalar_lea.sflag [#allocation7], %s204_s28  ;;  %s217_s7 = scalar_lea.vmem [#allocation6], %s557_s4 }
  0x4e   : > { %720 = dma.done.wait (%p970_p13), %s214_s5, 128  }
  0x4f   : > { %722 = vsyncadd (%p970_p13), %s214_s5, 4294967168  ;;  %v259_v0 = vlaneseq  ;;  %v749_v2 = vmov 0.0   ;;  %v264_v3 = vld [vmem:[%s208_s10] sm:$0xff]  ;;  %v265_v4 = vld [vmem:[%s217_s7] sm:$0xff]  ;;  %vm271_vm1 = vcmask 1043456   ;;  %vm332_vm5 = vcmask 1041409  }
  0x50   : > { %vm266_vm2 = vcmp.ne.f32.partialorder %v265_v4, 255.0  ;;  %v288_v8 = vsub.f32 %v264_v3, %v265_v4  ;;  %v750_v18 = vmov 1966171168   ;;  %vm334_vm6 = vcmask 1045509   ;;  %p248_p7 = scmp.lt.s32.totalorder %s737_s15, 1 }
  0x51   : > { %vm920_vm0 = vcmp.lt.s32.totalorder %v259_v0, 256  ;;  %v267_v5 = vsel %vm266_vm2, 1.0, %v749_v2  ;;  %v356_v19 = vunpack.c.l.s4 %v750_v18  ;;  %v359_v29 = vshrl.u32 %v259_v0, 7 }
  0x52   : > { %263 = vst.msk [vmem:[#allocation3] sm:$0x3] %vm920_vm0, %v749_v2  ;;  %v269_v6 = vcombine.high %v267_v5, %v267_v5  ;;  %v272_v7 = vsel %vm271_vm1, %v267_v5, inf  ;;  %v289_v13 = vand.u32 2147483647, %v288_v8  ;;  %vm337_vm7 = vcmask 1042434  }
  0x53   : > { %v273_v9 = vrot.slane %v272_v7, 4  ;;  %v357_v28 = vunpack.c.0.s8 %v356_v19  ;;  %vm339_vm8 = vcmask 1046534   ;;  %vm342_vm9 = vcmask 1043459   ;;  %s981_s15 = smov (!%p248_p7, %s737_s15), 1 }
  0x54   : > { %v279_v10 = vsel %vm271_vm1, %v269_v6, inf  ;;  %v295_v20 = vcombine.high %v289_v13, %v289_v13  ;;  %v296_v23 = vrot.slane %v289_v13, 1  ;;  %v298_v24 = vrot.slane %v289_v13, 2  ;;  %s250_s29 = scalar_lea.vmem %s960_s2, %s981_s15  ;;  %s253_s12 = scalar_lea.vmem %s961_s3, %s981_s15 }
  0x55   : > { %v274_v11 = vmin.f32 %v272_v7, %v273_v9  ;;  %v280_v12 = vrot.slane %v279_v10, 4  ;;  %v300_v25 = vrot.slane %v289_v13, 3  ;;  %v360_v39 = vsub.s32 %v357_v28, %v359_v29 }
  0x56   : > { %v297_v30 = vrot.slane %v295_v20, 1  ;;  %v299_v31 = vrot.slane %v295_v20, 2  ;;  %v301_v32 = vrot.slane %v295_v20, 3  ;;  %vm344_vm10 = vcmask 1047559  }
  0x57   : > { %v275_v14 = vrot.slane %v274_v11, 2  ;;  %v281_v15 = vmin.f32 %v279_v10, %v280_v12  ;;  %v402_v4 = vsub.s32 0, %v359_v29  ;;  %v406_v5 = vsub.s32 1, %v359_v29 }
  0x58   : > { %vm410_vm11 = vcmask 1040384   ;;  %vm396_vm12 = vcmask 0  }
  0x59   : > { %v276_v16 = vmin.f32 %v274_v11, %v275_v14  ;;  %v282_v17 = vrot.slane %v281_v15, 2  ;;  %v349_v56 = vld [vmem:[#allocation3] sm:$0x3] }
  0x5b   : > { %v277_v21 = vrot.slane %v276_v16, 1  ;;  %v283_v22 = vmin.f32 %v281_v15, %v282_v17 }
  0x5d   : > { %v278_v26 = vmin.f32 %v276_v16, %v277_v21  ;;  %v284_v27 = vrot.slane %v283_v22, 1 }
  0x5f   : > { %v285_v33 = vmin.f32 %v283_v22, %v284_v27  ;;  %vm286_vm3 = vcmp.gt.f32.partialorder %v278_v26, 0.0 }
  0x60   : > { %v310_v34 = vsel %vm286_vm3, %v289_v13, 0.0  ;;  %v312_v35 = vsel %vm286_vm3, %v296_v23, 0.0  ;;  %v314_v36 = vsel %vm286_vm3, %v298_v24, 0.0  ;;  %v316_v37 = vsel %vm286_vm3, %v300_v25, 0.0 }
  0x61   : > { %vm287_vm4 = vcmp.gt.f32.partialorder %v285_v33, 0.0  ;;  %v559_v38 = vsel %vm286_vm3, 1.0, %v749_v2 }
  0x62   : > { %v311_v40 = vsel %vm287_vm4, %v295_v20, 0.0  ;;  %v313_v41 = vsel %vm287_vm4, %v297_v30, 0.0  ;;  %v315_v42 = vsel %vm287_vm4, %v299_v31, 0.0  ;;  %v317_v43 = vsel %vm287_vm4, %v301_v32, 0.0 }
  0x63   : > { %v327_v44 = vcombine.low %v310_v34, %v311_v40  ;;  %v328_v45 = vcombine.low %v312_v35, %v313_v41  ;;  %v329_v46 = vcombine.low %v314_v36, %v315_v42  ;;  %v330_v47 = vcombine.low %v316_v37, %v317_v43 }
  0x64   : > { %v560_v48 = vsel %vm287_vm4, 1.0, %v749_v2 }
  0x65   : > { %v331_v49 = vrot.slane %v328_v45, 7  ;;  %v336_v50 = vrot.slane %v329_v46, 6  ;;  %v354_v51 = vcombine.low %v559_v38, %v560_v48  ;;  %v341_v53 = vrot.slane %v330_v47, 5 }
  0x67   : > { %v333_v52 = vsel %vm332_vm5, %v331_v49, %v327_v44  ;;  %v361_v54 = vrot.slane %v354_v51, %v360_v39 }
  0x68   : > { %v335_v55 = vsel %vm334_vm6, %v331_v49, %v333_v52 }
  0x69   : > { %v338_v57 = vsel %vm337_vm7, %v336_v50, %v335_v55  ;;  %v368_v58 = vrot.slane %v361_v54, %v360_v39 }
  0x6a   : > { %v340_v59 = vsel %vm339_vm8, %v336_v50, %v338_v57 }
  0x6b   : > { %v343_v60 = vsel %vm342_vm9, %v341_v53, %v340_v59  ;;  %v370_v61 = vadd.f32 %v368_v58, %v349_v56 }
  0x6c   : > { %v345_v62 = vsel %vm344_vm10, %v341_v53, %v343_v60 }
  0x6d   : > { %v381_v63 = vcombine.high %v345_v62, %v345_v62  ;;  %v383_v0 = vsel %vm271_vm1, %v345_v62, 0.0  ;;  %375 = vst.msk [vmem:[#allocation3] sm:$0x3] %vm920_vm0, %v370_v61 }
  0x6f   : > { %v384_v2 = vsel %vm271_vm1, %v381_v63, 0.0 }
  0x70   : > { %v385_v3 = vadd.f32 %v384_v2, %v383_v0 }
  0x72   : > { %386 = vadd.xlane.f32.xlu0 %v385_v3 }
  0x74   : > { %v398_v6 = vld [vmem:[#allocation3] sm:$0x3] }
  0x75   : > { %v403_v7 = vrot.slane %v398_v6, %v402_v4  ;;  %v407_v8 = vrot.slane %v398_v6, %v406_v5 }
  0x77   : > { %v411_v9 = vsel %vm410_vm11, %v403_v7, 0.0  ;;  %v412_v10 = vsel %vm410_vm11, %v407_v8, 0.0 }
  0x78   : > { %v413_v11 = vadd.f32 %v412_v10, %v411_v9 }
  0x7a   : > { %414 = vadd.xlane.f32.xlu0 %v413_v11 }
  0xff   : > { %v387_v12 = vpop.xlane.xlu0 %386 }
 0x100   : > { %v388_v13 = vrot.slane %v387_v12, 4 }
 0x102   : > { %v389_v1 = vadd.f32 %v388_v13, %v387_v12 }
 0x104   : > { %v390_v14 = vrot.slane %v389_v1, 2 }
 0x106   : > { %v391_v15 = vadd.f32 %v390_v14, %v389_v1 }
 0x107   : > { %v415_v16 = vpop.xlane.xlu0 %414 }
 0x108   : > { %v416_v17 = vrot.slane %v415_v16, 4  ;;  %v392_v18 = vrot.slane %v391_v15, 1 }
 0x10a   : > { %v417_v19 = vadd.f32 %v416_v17, %v415_v16  ;;  %v393_v20 = vadd.f32 %v392_v18, %v391_v15 }
 0x10c   : > { %v418_v21 = vrot.slane %v417_v19, 2  ;;  %565 = vpush %v393_v20 }
 0x10e   : > { %v419_v22 = vadd.f32 %v418_v21, %v417_v19 }
 0x110   : > { %v420_v23 = vrot.slane %v419_v22, 1 }
 0x112   : > { %v421_v24 = vadd.f32 %v420_v23, %v419_v22 }
 0x114   : > { %567 = vpush %v421_v24 }
 0x13d   : > { %s566_s9 = spop %565 }
 0x13e   : > { %v395_v25 = vstv %s566_s9 }
 0x13f   : > { %397 = vst.msk [vmem:[%s250_s29] sm:$0x1] %vm396_vm12, %v395_v25 }
 0x145   : > { %s568_s26 = spop %567 }
 0x146   : > { %v423_v26 = vstv %s568_s26 }
 0x147   : > { %424 = vst.msk [vmem:[%s253_s12] sm:$0x1] %vm396_vm12, %v423_v26 }
 0x148 PF: > { %s20_s17 = sadd.s32 1, %s745_s17   ;;  %s973_s12 = smov %s729_s13 }
 0x149   : > { %p17_p9 = scmp.ge.s32.totalorder %s20_s17, 4   ;;  %s974_s13 = smov %s733_s14 }
 0x14a   : > { %s975_s14 = smov %s820_s24  ;;  %s976_s15 = smov %s741_s16 }
 0x14b   : > { %s977_s16 = smov %s979_s19  ;;  %19 = sbr.rel (!%p17_p9) target bundleno = 6 (0x6), region = 101 }
 0x152   :  { %454 = vsyncpa [#allocation5], 1 }
 0x153   :  { %456 = vsyncpa [#allocation5 + $0x1], 1 }
 0x154   :  { %457 = vsyncpa [#allocation7], 1 }
 0x155   :  { %459 = vsyncpa [#allocation7 + $0x1], 1 }

</bundles_post_ra>
